<compile_context>
chip_gen: v6e
topology: v6e:2x2x1
jax: 0.10.0
libtpu: 0.0.40
codegen_flags: <defaults>
</compile_context>

<pallas_src>
import functools

import jax
import jax.numpy as jnp
from jax import lax
from jax.experimental import pallas as pl
from jax.experimental.pallas import tpu as pltpu

_LANE = 128
_VMEM_LIMIT = 48 * 1024 * 1024


def _round_up(x, m):
    return (x + m - 1) // m * m


# ----------------------------- Pallas kernels ------------------------------

def _mm_bias_kernel(x_ref, w_ref, b_ref, o_ref, *, relu):
    # (TM, K)bf16 @ (K, C)bf16 -> f32 acc, + bias(f32), opt relu, store bf16.
    y = jnp.dot(x_ref[...], w_ref[...], preferred_element_type=jnp.float32)
    y = y + b_ref[...]
    if relu:
        y = jnp.maximum(y, 0.0)
    o_ref[...] = y.astype(o_ref.dtype)


def _mm_bias_add_kernel(x_ref, w_ref, b_ref, r_ref, o_ref, *, relu):
    # Same as above, plus fused residual add before the ReLU.
    y = jnp.dot(x_ref[...], w_ref[...], preferred_element_type=jnp.float32)
    y = y + b_ref[...] + r_ref[...].astype(jnp.float32)
    if relu:
        y = jnp.maximum(y, 0.0)
    o_ref[...] = y.astype(o_ref.dtype)


def _conv3x3_kernel(x_ref, w_ref, b_ref, o_ref, *, Ho, Wo):
    # One image, stride 1:
    #   x_ref (Ho+2, Wo+2, C) bf16 (spatially padded), w_ref (9, C, Cout) bf16
    #   (BN scale folded), b_ref (1, Cout) f32, o_ref (Ho, Wo, Cout) bf16.
    # 9-tap accumulation in f32; the padded image is read from HBM exactly once
    # (no materialized im2col).
    C = x_ref.shape[-1]
    Cout = o_ref.shape[-1]
    acc = jnp.zeros((Ho * Wo, Cout), jnp.float32)
    for di in range(3):
        for dj in range(3):
            xs = x_ref[di:di + Ho, dj:dj + Wo, :]
            acc = acc + jnp.dot(xs.reshape(Ho * Wo, C), w_ref[di * 3 + dj],
                                preferred_element_type=jnp.float32)
    y = jnp.maximum(acc + b_ref[...], 0.0)
    o_ref[...] = y.reshape(Ho, Wo, Cout).astype(o_ref.dtype)


# ----------------------------- kernel wrappers ------------------------------

def fused_matmul_bias(x2d, w2d, bias, residual=None, relu=True):
    """y = relu?( x2d @ w2d + bias (+ residual) ); bf16 MXU, f32 accumulate."""
    M, K = x2d.shape
    K2, C = w2d.shape
    assert K == K2

    # Row tile: large enough to amortize per-step overhead; keep >= 2 grid
    # steps when possible so both v7x TensorCores get work. Rows are padded
    # up to a tile multiple and sliced off afterwards.
    TM = 512
    if M <= TM:
        TM = max(8, _round_up(max(M // 2, 1), 8))
    Mp = _round_up(M, TM)
    grid = (Mp // TM,)

    x2d = x2d.astype(jnp.bfloat16)
    w2d = w2d.astype(jnp.bfloat16)
    bias2d = bias.reshape(1, C).astype(jnp.float32)
    if Mp != M:
        x2d = jnp.pad(x2d, ((0, Mp - M), (0, 0)))

    in_specs = [
        pl.BlockSpec((TM, K), lambda i: (i, 0)),
        pl.BlockSpec((K, C), lambda i: (0, 0)),
        pl.BlockSpec((1, C), lambda i: (0, 0)),
    ]
    args = [x2d, w2d, bias2d]
    bytes_accessed = Mp * K * 2 + K * C * 2 + C * 4 + Mp * C * 2

    if residual is not None:
        residual = residual.astype(jnp.bfloat16)
        if Mp != M:
            residual = jnp.pad(residual, ((0, Mp - M), (0, 0)))
        in_specs.append(pl.BlockSpec((TM, C), lambda i: (i, 0)))
        args.append(residual)
        bytes_accessed += Mp * C * 2
        kernel = functools.partial(_mm_bias_add_kernel, relu=relu)
    else:
        kernel = functools.partial(_mm_bias_kernel, relu=relu)

    out = pl.pallas_call(
        kernel,
        out_shape=jax.ShapeDtypeStruct((Mp, C), jnp.bfloat16),
        grid_spec=pltpu.PrefetchScalarGridSpec(
            num_scalar_prefetch=0,
            grid=grid,
            in_specs=in_specs,
            out_specs=pl.BlockSpec((TM, C), lambda i: (i, 0)),
        ),
        compiler_params=pltpu.CompilerParams(
            dimension_semantics=("parallel",),
            vmem_limit_bytes=_VMEM_LIMIT),
        cost_estimate=pl.CostEstimate(flops=2 * Mp * K * C,
                                      transcendentals=0,
                                      bytes_accessed=bytes_accessed),
    )(*args)
    return out[:M] if Mp != M else out


def conv3x3_bn_relu(x_pad_nhwc, w9, bias):
    """3x3 conv, stride 1, spatial pad already applied. One image per grid step."""
    N, Hp, Wp, C = x_pad_nhwc.shape
    Ho, Wo = Hp - 2, Wp - 2
    Cout = w9.shape[-1]
    bias2d = bias.reshape(1, Cout).astype(jnp.float32)
    kernel = functools.partial(_conv3x3_kernel, Ho=Ho, Wo=Wo)
    bytes_accessed = (x_pad_nhwc.size * 2 + w9.size * 2 + Cout * 4
                      + N * Ho * Wo * Cout * 2)
    return pl.pallas_call(
        kernel,
        out_shape=jax.ShapeDtypeStruct((N, Ho, Wo, Cout), jnp.bfloat16),
        grid_spec=pltpu.PrefetchScalarGridSpec(
            num_scalar_prefetch=0,
            grid=(N,),
            in_specs=[
                pl.BlockSpec((None, Hp, Wp, C), lambda n: (n, 0, 0, 0)),
                pl.BlockSpec((9, C, Cout), lambda n: (0, 0, 0)),
                pl.BlockSpec((1, Cout), lambda n: (0, 0)),
            ],
            out_specs=pl.BlockSpec((None, Ho, Wo, Cout), lambda n: (n, 0, 0, 0)),
        ),
        compiler_params=pltpu.CompilerParams(
            dimension_semantics=("parallel",),
            vmem_limit_bytes=_VMEM_LIMIT),
        cost_estimate=pl.CostEstimate(flops=2 * N * Ho * Wo * 9 * C * Cout,
                                      transcendentals=0,
                                      bytes_accessed=bytes_accessed),
    )(x_pad_nhwc.astype(jnp.bfloat16), w9.astype(jnp.bfloat16), bias2d)


# ------------------------------ glue helpers -------------------------------

def _im2col_3x3(x_nhwc, stride):
    """Fallback patch extraction for stride != 1. Returns (N, Ho, Wo, 9*C)."""
    N, H, W, C = x_nhwc.shape
    Ho = (H + 2 - 3) // stride + 1
    Wo = (W + 2 - 3) // stride + 1
    xp = jnp.pad(x_nhwc, ((0, 0), (1, 1), (1, 1), (0, 0)))
    cols = []
    for di in range(3):
        for dj in range(3):
            cols.append(
                xp[:, di:di + (Ho - 1) * stride + 1:stride,
                      dj:dj + (Wo - 1) * stride + 1:stride, :])
    return jnp.concatenate(cols, axis=-1)  # feature index = (di*3+dj)*C + c


def _bn_fold(gamma, beta, mean, var, eps=1e-5):
    scale = gamma / jnp.sqrt(var + eps)
    return scale, beta - mean * scale


def make_params(key, in_planes, planes, expansion=4):
    ks = jax.random.split(key, 8)
    p = {}
    # conv weights in PyTorch layout (Cout, Cin, kh, kw), then converted.
    w1 = 0.1 * jax.random.normal(ks[0], (planes, in_planes, 1, 1), jnp.float32)
    w2 = 0.1 * jax.random.normal(ks[1], (planes, planes, 3, 3), jnp.float32)
    w3 = 0.1 * jax.random.normal(ks[2], (expansion * planes, planes, 1, 1), jnp.float32)
    ws = 0.1 * jax.random.normal(ks[3], (expansion * planes, in_planes, 1, 1), jnp.float32)
    p["w1"] = w1[:, :, 0, 0].T                                   # (Cin, planes)
    p["w2"] = jnp.transpose(w2, (2, 3, 1, 0)).reshape(9 * planes, planes)
    p["w3"] = w3[:, :, 0, 0].T                                   # (planes, 4*planes)
    p["ws"] = ws[:, :, 0, 0].T                                   # (Cin, 4*planes)

    def bn(k, c):
        kk = jax.random.split(k, 4)
        gamma = 1.0 + 0.1 * jax.random.normal(kk[0], (c,), jnp.float32)
        beta = 0.1 * jax.random.normal(kk[1], (c,), jnp.float32)
        mean = 0.1 * jax.random.normal(kk[2], (c,), jnp.float32)
        var = 1.0 + 0.1 * jnp.abs(jax.random.normal(kk[3], (c,), jnp.float32))
        return _bn_fold(gamma, beta, mean, var)

    p["s1"], p["b1"] = bn(ks[4], planes)
    p["s2"], p["b2"] = bn(ks[5], planes)
    p["s3"], p["b3"] = bn(ks[6], expansion * planes)
    p["ss"], p["bs"] = bn(ks[7], expansion * planes)
    return p


def _prep_params(params, in_planes, planes, expansion=4):
    """Fold BN scale into weights, pad channel dims to 128 lanes, cast to bf16."""
    cin_p = _round_up(in_planes, _LANE)
    mid_p = _round_up(planes, _LANE)
    out_c = expansion * planes
    out_p = _round_up(out_c, _LANE)

    def pad2d(w, kp, cp):
        K, C = w.shape
        return jnp.pad(w, ((0, kp - K), (0, cp - C)))

    def pad1d(v, cp):
        return jnp.pad(v, (0, cp - v.shape[0]))

    q = {"cin_p": cin_p, "mid_p": mid_p, "out_p": out_p}

    q["w1"] = pad2d(params["w1"] * params["s1"][None, :], cin_p, mid_p).astype(jnp.bfloat16)
    q["b1"] = pad1d(params["b1"], mid_p).astype(jnp.float32)

    w2 = params["w2"].reshape(3, 3, planes, planes) * params["s2"][None, None, None, :]
    w2 = jnp.pad(w2, ((0, 0), (0, 0), (0, mid_p - planes), (0, mid_p - planes)))
    q["w2"] = w2.reshape(9, mid_p, mid_p).astype(jnp.bfloat16)
    q["b2"] = pad1d(params["b2"], mid_p).astype(jnp.float32)

    q["w3"] = pad2d(params["w3"] * params["s3"][None, :], mid_p, out_p).astype(jnp.bfloat16)
    q["b3"] = pad1d(params["b3"], out_p).astype(jnp.float32)

    q["ws"] = pad2d(params["ws"] * params["ss"][None, :], cin_p, out_p).astype(jnp.bfloat16)
    q["bs"] = pad1d(params["bs"], out_p).astype(jnp.float32)
    return q


def bottleneck_forward(x_nchw, params, in_planes, planes, stride=1, expansion=4):
    N, Cin, H, W = x_nchw.shape
    assert Cin == in_planes
    out_c = expansion * planes
    q = _prep_params(params, in_planes, planes, expansion)
    cin_p, mid_p, out_p = q["cin_p"], q["mid_p"], q["out_p"]

    x = jnp.transpose(x_nchw, (0, 2, 3, 1))                       # -> NHWC
    x = jnp.pad(x, ((0, 0), (0, 0), (0, 0), (0, cin_p - Cin)))    # lane-pad C
    x = x.astype(jnp.bfloat16)

    # conv1 (1x1) + folded bn1 + relu
    o1 = fused_matmul_bias(x.reshape(-1, cin_p), q["w1"], q["b1"], relu=True)
    o1 = o1.reshape(N, H, W, mid_p)

    # conv2 (3x3, pad=1) + folded bn2 + relu
    if stride == 1:
        Ho, Wo = H, W
        o1p = jnp.pad(o1, ((0, 0), (1, 1), (1, 1), (0, 0)))
        o2 = conv3x3_bn_relu(o1p, q["w2"], q["b2"])               # (N,Ho,Wo,mid_p)
        o2 = o2.reshape(-1, mid_p)
    else:
        # TODO(synk): fold the spatial stride into the conv2 kernel index_map
        # instead of this im2col fallback (only used when stride != 1).
        Ho = (H + 2 - 3) // stride + 1
        Wo = (W + 2 - 3) // stride + 1
        patches = _im2col_3x3(o1, stride)
        w2flat = q["w2"].reshape(9 * mid_p, mid_p)
        o2 = fused_matmul_bias(patches.reshape(-1, 9 * mid_p), w2flat, q["b2"],
                               relu=True)

    # shortcut path
    if stride != 1 or in_planes != out_c:
        if stride == 1:
            xs = x
        else:
            # TODO(synk): fold the stride into the shortcut matmul's index_map
            # instead of materializing the strided slice.
            xs = x[:, ::stride, ::stride, :][:, :Ho, :Wo, :]
        sc = fused_matmul_bias(xs.reshape(-1, cin_p), q["ws"], q["bs"],
                               relu=False)
    else:
        sc = x.reshape(-1, cin_p)          # identity (cin_p == out_p here)

    # conv3 (1x1) + folded bn3 + residual add + relu, all fused
    o3 = fused_matmul_bias(o2, q["w3"], q["b3"], residual=sc, relu=True)
    o3 = o3.reshape(N, Ho, Wo, out_p)[:, :, :, :out_c]
    return jnp.transpose(o3, (0, 3, 1, 2)).astype(jnp.float32)    # -> NCHW


# --------------------------- reference (pure JAX) ---------------------------

def _reference(x_nchw, params, in_planes, planes, stride=1, expansion=4):
    def conv1x1(x, w2d, s):  # x NCHW, w2d (Cin, Cout)
        w = w2d.T[:, :, None, None]
        return lax.conv_general_dilated(x, w, (s, s), "VALID")

    def conv3x3(x, w2d, s):  # w2d (9*Cin, Cout) in (kh,kw,Cin) row order
        Cin = x.shape[1]
        Cout = w2d.shape[1]
        w = jnp.transpose(w2d.reshape(3, 3, Cin, Cout), (3, 2, 0, 1))
        return lax.conv_general_dilated(x, w, (s, s), ((1, 1), (1, 1)))

    def bn(x, sc, bi):
        return x * sc[None, :, None, None] + bi[None, :, None, None]

    out = jnp.maximum(bn(conv1x1(x_nchw, params["w1"], 1), params["s1"], params["b1"]), 0.0)
    out = jnp.maximum(bn(conv3x3(out, params["w2"], stride), params["s2"], params["b2"]), 0.0)
    out = bn(conv1x1(out, params["w3"], 1), params["s3"], params["b3"])
    if stride != 1 or in_planes != expansion * planes:
        sc = bn(conv1x1(x_nchw, params["ws"], stride), params["ss"], params["bs"])
    else:
        sc = x_nchw
    return jnp.maximum(out + sc, 0.0)


# --------------------------------- driver -----------------------------------

if __name__ == "__main__":
    in_planes, planes, stride = 4, 4, 1
    N, H, W = 2, 16, 16

    key = jax.random.PRNGKey(0)
    kx, kp = jax.random.split(key)
    x = jax.random.normal(kx, (N, in_planes, H, W), jnp.float32)
    params = make_params(kp, in_planes, planes)

    out = bottleneck_forward(x, params, in_planes, planes, stride=stride)
    out = jax.block_until_ready(out)

    ref = jax.block_until_ready(_reference(x, params, in_planes, planes, stride=stride))
    assert out.shape == (N, 4 * planes, H, W), out.shape
    # bf16 matmul operands -> slightly looser tolerance vs the f32 reference.
    assert jnp.allclose(out, ref, atol=3e-2, rtol=3e-2)

    print("KERNEL_OK")
</pallas_src>

<mosaic_0001>
module attributes {stable_mosaic.version = 11 : i64} {
  func.func @_mm_bias_kernel(%arg0: i32, %arg1: memref<256x128xbf16, #tpu.memory_space<vmem>>, %arg2: memref<128x128xbf16, #tpu.memory_space<vmem>>, %arg3: memref<1x128xf32, #tpu.memory_space<vmem>>, %arg4: memref<256x128xbf16, #tpu.memory_space<vmem>>) attributes {dimension_semantics = [#tpu.dimension_semantics<parallel>], iteration_bounds = array<i64: 2>, scalar_prefetch = 0 : i64, scratch_operands = 0 : i64, tpu.core_type = #tpu.core_type<tc>, window_params = [{transform_indices = @transform_0, window_bounds = array<i64: 256, 128>}, {pipeline_mode = #tpu.pipeline_mode<synchronous>, transform_indices = @transform_1, window_bounds = array<i64: 128, 128>}, {pipeline_mode = #tpu.pipeline_mode<synchronous>, transform_indices = @transform_2, window_bounds = array<i64: 1, 128>}, {transform_indices = @transform_3, window_bounds = array<i64: 256, 128>}]} {
    %c0 = arith.constant 0 : index
    %c0_0 = arith.constant 0 : index
    %0 = vector.load %arg1[%c0, %c0_0] : memref<256x128xbf16, #tpu.memory_space<vmem>>, vector<256x128xbf16>
    %c0_1 = arith.constant 0 : index
    %c0_2 = arith.constant 0 : index
    %1 = vector.load %arg2[%c0_1, %c0_2] : memref<128x128xbf16, #tpu.memory_space<vmem>>, vector<128x128xbf16>
    %cst = arith.constant dense<0.000000e+00> : vector<256x128xf32>
    %2 = tpu.matmul %0, %1, %cst {dimension_numbers = #tpu.dot_dimension_numbers<[1], [0], [0], [1], [0, 0, 1, 1], [], []>} : vector<256x128xbf16>, vector<128x128xbf16>, vector<256x128xf32> -> vector<256x128xf32>
    %c0_3 = arith.constant 0 : index
    %c0_4 = arith.constant 0 : index
    %3 = vector.load %arg3[%c0_3, %c0_4] : memref<1x128xf32, #tpu.memory_space<vmem>>, vector<1x128xf32>
    %4 = vector.broadcast %3 : vector<1x128xf32> to vector<256x128xf32>
    %5 = arith.addf %2, %4 : vector<256x128xf32>
    %cst_5 = arith.constant 0.000000e+00 : f32
    %6 = vector.broadcast %cst_5 : f32 to vector<256x128xf32>
    %7 = arith.maximumf %5, %6 : vector<256x128xf32>
    %8 = arith.truncf %7 : vector<256x128xf32> to vector<256x128xbf16>
    %c0_6 = arith.constant 0 : index
    %c0_7 = arith.constant 0 : index
    %9 = vector.load %arg4[%c0_6, %c0_7] : memref<256x128xbf16, #tpu.memory_space<vmem>>, vector<256x128xbf16>
    tpu.vector_store %arg4[%c0_6, %c0_7], %8 {strides = array<i32>} : memref<256x128xbf16, #tpu.memory_space<vmem>>, vector<256x128xbf16>,
    return
  }
  func.func @transform_0(%arg0: i32) -> (i32, i32) {
    %c0_i32 = arith.constant 0 : i32
    %c0_i32_0 = arith.constant 0 : i32
    return %arg0, %c0_i32 : i32, i32
  }
  func.func @transform_1(%arg0: i32) -> (i32, i32) {
    %c0_i32 = arith.constant 0 : i32
    %c0_i32_0 = arith.constant 0 : i32
    %c0_i32_1 = arith.constant 0 : i32
    return %c0_i32, %c0_i32_0 : i32, i32
  }
  func.func @transform_2(%arg0: i32) -> (i32, i32) {
    %c0_i32 = arith.constant 0 : i32
    %c0_i32_0 = arith.constant 0 : i32
    %c0_i32_1 = arith.constant 0 : i32
    return %c0_i32, %c0_i32_0 : i32, i32
  }
  func.func @transform_3(%arg0: i32) -> (i32, i32) {
    %c0_i32 = arith.constant 0 : i32
    %c0_i32_0 = arith.constant 0 : i32
    return %arg0, %c0_i32 : i32, i32
  }
}

</mosaic_0001>

<bundles_post_ra>
// kernel: tpu_custom_call.1
= control target key start
LH: loop header
LB: loop body
LE: loop exit
PB: predicated region body
PF: predicated region fallthrough
CT: control target
= control target key end

     0   :  { %8 = vsyncpa [#allocation3], 0  ;;  %s1643_s0 = inlined_call_operand.hbm [shape: bf16[512,128], index: 0, kind: input, shape index: {}]   ;;  %s1644_s1 = inlined_call_operand.hbm [shape: bf16[128,128], index: 1, kind: input, shape index: {}]   ;;  %s1645_s2 = inlined_call_operand.vmem [shape: f32[1,128], index: 2, kind: input, shape index: {}]   ;;  %s1646_s3 = inlined_call_operand.hbm [shape: bf16[512,128], index: 3, kind: output, shape index: {}]  }
   0x1   :  { %10 = vsyncpa [#allocation3 + $0x1], 0 }
   0x2   :  { %11 = vsyncpa [#allocation6], 0 }
   0x3   :  { %12 = vsyncpa [#allocation4], 0 }
   0x4   :  { %14 = vsyncpa [#allocation4 + $0x1], 0  ;;  %s1382_s12 = smov 0   ;;  %s1384_s13 = smov 0  }
   0x5   :  { %s1386_s14 = smov 0   ;;  %s1388_s15 = smov 0  }
   0x6 LB: > { %s1403_s16 = sadd.s32 4294967295, %s1353_s15   ;;  %s856_s17 = sadd.s32 4294967294, %s1353_s15   ;;  %s1353_s15 = sphi %s1388_s15, %s1668_s15   ;;  %s1349_s14 = sphi %s1386_s14, %s1667_s14   ;;  %s1345_s13 = sphi %s1384_s13, %s1666_s13   ;;  %s1341_s12 = sphi %s1382_s12, %s1665_s12  }
   0x7   : > { %p40_p0 = scmp.ne.s32.totalorder %s1345_s13, %s1341_s12  ;;  %p1647_p1 = scmp.eq.s32.totalorder %s1403_s16, 0 }
   0x8   : > { %p112_p3 = scmp.eq.s32.totalorder %s856_s17, 1  ;;  %p857_p5 = scmp.ge.s32.totalorder %s1353_s15, 1 }
   0x9   : > { %p1412_p4 = por %p1647_p1, %p40_p0  ;;  %p119_p7 = scmp.lt.s32.totalorder %s1353_s15, 3 }
   0xa   : > { %p1417_p6 = por %p112_p3, %p40_p0  ;;  %s1355_s21 = smov [#allocation5]  }
   0xb   : > { %s1651_s18 = scalar_select %p1412_p4, 1, 0 }
   0xc   : > { %s1652_s19 = scalar_select %p1417_p6, 1, 0 }
   0xd   : > { %p1422_p8 = pnand %p857_p5, %p119_p7  ;;  %s131_s22 = sshll.u32 %s1355_s21, 4  ;;  %s132_s22 = int_to_ptr.vmem [resolvable:$true] %s131_s22 }
   0xe   : > { %s1436_s24 = sadd.s32 1, %s1353_s15   ;;  %s27_s25 = sadd.s32 1, %s1349_s14 }
   0xf   : > { %s1653_s20 = scalar_select %p1422_p8, 1, 0 }
  0x10   : > { %p1154_p9 = pneg %p1422_p8  ;;  %s24_s26 = ssub.s32 %s1353_s15, %s1436_s24 }
  0x11   : > { %s1242_s27 = scalar_lea.vmem %s132_s22, 1024  ;;  %p1250_p5 = scmp.lt.s32.totalorder %s132_s22, %s132_s22 }
  0x12   : > { %p1431_p11 = pnand %p1154_p9, %p1647_p1  ;;  %p1243_p13 = scmp.ne.s32.totalorder %s132_s22, %s1242_s27 }
  0x13   : > { %p1251_p7 = scmp.lt.s32.totalorder %s1242_s27, %s1242_s27 }
  0x14   : > { %p1233_p12 = pneg %p1431_p11 }
  0x15   : > { %p1252_p10 = por %p1251_p7, %p1250_p5 }
  0x16   : > { %p1245_p0 = pnand %p1243_p13, %p1233_p12 }
  0x18   : > { %p1246_p3 = pneg %p1245_p0 }
  0x1a   : > { %p1253_p2 = pnand %p1252_p10, %p1246_p3 }
  0x1c   : > { %1256 = shalt.err (!%p1253_p2)
}
  0x1d   : > { %s1356_s28 = smov 64   ;;  %s1357_s29 = smov 4  }
  0x1e   : > { %1157 = dma.hbm_to_vmem [thread:$0]  (!%p1431_p11), %s1644_s1, 1024, %s132_s22, [#allocation6], %s1356_s28, %s1356_s28, %s1357_s29  }
  0x1f   : > { %p25_p2 = scmp.eq.s32.totalorder %s24_s26, 0  ;;  %p34_p9 = scmp.ne.s32.totalorder %s1349_s14, %s1345_s13 }
  0x20   : > { %p35_p10 = scmp.eq.s32.totalorder %s1353_s15, 0  ;;  %p1167_p12 = scmp.lt.s32.totalorder %s1353_s15, 2 }
  0x21   : > { %s1456_s5 = scalar_select %p25_p2, %s1349_s14, %s27_s25  }
  0x22   : > { %p36_p13 = por %p35_p10, %p34_p9  ;;  %p1655_p0 = scmp.eq.s32.totalorder %s1403_s16, 1 }
  0x23   : > { %s148_s7 = sand.u32 1, %s1349_s14   ;;  %s929_s8 = sshll.u32 %s1353_s15, 11 }
  0x24   : > { %p1460_p3 = por %p1655_p0, %p34_p9  ;;  %s860_s9 = sshll.u32 %s148_s7, 7 }
  0x25   : > { %s1469_s17 = scalar_lea.hbm %s1643_s0, %s929_s8  ;;  %s152_s21 = scalar_lea.vmem [#allocation2], %s860_s9 }
  0x26   : > { %s1656_s6 = scalar_select %p1460_p3, 1, 0 }
  0x27   : > { %s159_s22 = sshll.u32 %s152_s21, 4  ;;  %p1471_p11 = pnand %p1167_p12, %p36_p13  ;;  %s1475_s22 = int_to_ptr.vmem [resolvable:$true] %s159_s22 }
  0x28   : > { %s1477_s25 = scalar_lea.sflag [#allocation3], %s148_s7  ;;  %s1257_s26 = scalar_lea.hbm %s1469_s17, 2048 }
  0x29   : > { %p1258_p5 = scmp.ne.s32.totalorder %s1469_s17, %s1257_s26  ;;  %p1259_p7 = pneg %p1471_p11 }
  0x2a   : > { %s1262_s4 = scalar_lea.hbm %s1643_s0, 4096  ;;  %p1263_p10 = scmp.lt.s32.totalorder %s1469_s17, %s1643_s0 }
  0x2b   : > { %p1260_p2 = pnand %p1259_p7, %p1258_p5  ;;  %p1264_p12 = scmp.lt.s32.totalorder %s1262_s4, %s1257_s26 }
  0x2d   : > { %p1261_p9 = pneg %p1260_p2  ;;  %p1265_p13 = por %p1264_p12, %p1263_p10 }
  0x2f   : > { %p1266_p0 = pnand %p1265_p13, %p1261_p9 }
  0x31   : > { %1269 = shalt.err (!%p1266_p0)
}
  0x32   : > { %s1270_s7 = scalar_lea.vmem %s1475_s22, 2048  ;;  %s1358_s10 = smov [#allocation2]  }
  0x33   : > { %p1271_p1 = scmp.ne.s32.totalorder %s1475_s22, %s1270_s7  ;;  %s1275_s11 = sshll.u32 %s1358_s10, 4  ;;  %s1276_s11 = int_to_ptr.vmem [resolvable:$false] %s1275_s11 }
  0x34   : > { %s1277_s21 = scalar_lea.vmem %s1276_s11, 4096  ;;  %p1278_p2 = scmp.lt.s32.totalorder %s1475_s22, %s1276_s11 }
  0x35   : > { %p1273_p6 = pnand %p1271_p1, %p1259_p7  ;;  %p1279_p3 = scmp.lt.s32.totalorder %s1277_s21, %s1270_s7 }
  0x37   : > { %p1274_p5 = pneg %p1273_p6  ;;  %p1280_p4 = por %p1279_p3, %p1278_p2 }
  0x39   : > { %p1281_p8 = pnand %p1280_p4, %p1274_p5 }
  0x3b   : > { %1284 = shalt.err (!%p1281_p8)
}
  0x3c   : > { %1161 = dma.hbm_to_vmem [thread:$0]  (!%p1471_p11), %s1469_s17, 2048, %s1475_s22, %s1477_s25, %s1356_s28, %s1356_s28, %s1357_s29  }
  0x3d   : > { %p1658_p1 = scmp.ne.s32.totalorder %s1653_s20, 0 }
  0x3e   : > { %s1504_s26 = sand.u32 (!%p1658_p1), 1, %s1345_s13   ;;  %p1659_p4 = scmp.ne.s32.totalorder (!%p1658_p1), %s1651_s18, 0 }
  0x3f   : > { %171 = sbr.rel (%p1658_p1) target bundleno = 348 (0x15c), region = 32  ;;  %s864_s27 = sshll.u32 (!%p1658_p1), %s1504_s26, 7 }
  0x40   : > { %s174_s30 = scalar_lea.sflag (!%p1658_p1), [#allocation3], %s1504_s26  ;;  %s1510_s23 = scalar_lea.vmem (!%p1658_p1), [#allocation2], %s864_s27 }
  0x44   : > { %1328 = dma.done.wait (%p1659_p4), %s174_s30, 2048  }
  0x45   : > { %1330 = vsyncadd (%p1659_p4), %s174_s30, 4294965248  ;;  %p1660_p6 = scmp.eq.s32.totalorder %s1403_s16, 0 }
  0x47   : > { %1332 = dma.done.wait (%p1660_p6), [#allocation6], 1024   ;;  %p1661_p8 = pmov %p1660_p6 }
  0x48   : > { %v1207_v0 = vld [vmem:[#allocation5 + $0x38] sm:$0xff]   ;;  %v1208_v1 = vld [vmem:[#allocation5 + $0x30] sm:$0xff]   ;;  %v1209_v2 = vld [vmem:[#allocation5 + $0x28] sm:$0xff]   ;;  %s1553_s28 = scalar_lea.vmem [#allocation7], %s864_s27  ;;  %s962_s29 = sshll.u32 %s1403_s16, 11 }
  0x49   : > { %1334 = vsyncadd (%p1661_p8), [#allocation6], 4294966272  ;;  %1082 = vmatprep.subr.bf16.mxu0 %v1207_v0  ;;  %1130 = vmatprep.subr.bf16.mxu1 %v1207_v0  ;;  %v1210_v3 = vld [vmem:[#allocation5 + $0x20] sm:$0xff]   ;;  %v1211_v6 = vld [vmem:[#allocation5 + $0x18] sm:$0xff]   ;;  %s773_s17 = sshll.u32 %s1553_s28, 4  ;;  %s1594_s4 = scalar_lea.hbm %s1646_s3, %s962_s29  ;;  %s1596_s17 = int_to_ptr.vmem [resolvable:$true] %s773_s17 }
  0x4a   : > { %1083 = vmatpush3.bf16.msra.mxu0 %v1207_v0  ;;  %1138 = vmatpush3.bf16.msra.mxu1 %v1207_v0  ;;  %v1215_v4 = vld [vmem:[%s1510_s23] sm:$0xff]   ;;  %v1212_v7 = vld [vmem:[#allocation5 + $0x10] sm:$0xff]   ;;  %v1213_v8 = vld [vmem:[#allocation5 + $0x8] sm:$0xff]   ;;  %s760_s16 = scalar_lea.sflag [#allocation4], %s1504_s26  ;;  %s1285_s8 = scalar_lea.vmem %s1596_s17, 2048 }
  0x4b   : > { %1084 = vmatprep.subr.bf16.mxu0 %v1208_v1  ;;  %1131 = vmatprep.subr.bf16.mxu1 %v1208_v1  ;;  %v1216_v5 = vld [vmem:[%s1510_s23 + $0x40] sm:$0xff]   ;;  %v1217_v10 = vld [vmem:[%s1510_s23 + $0x8] sm:$0xff]   ;;  %v1219_v12 = vld [vmem:[%s1510_s23 + $0x10] sm:$0xff]   ;;  %p1286_p3 = scmp.ne.s32.totalorder %s1596_s17, %s1285_s8  ;;  %p1662_p11 = scmp.ne.s32.totalorder %s1656_s6, 0 }
  0x4c   : > { %1098 = vmatprep.mubr.bf16.mxu0 %v1215_v4  ;;  %1114 = vmatprep.mubr.bf16.mxu1 %v1216_v5  ;;  %v1214_v9 = vld [vmem:[#allocation5] sm:$0xff]   ;;  %v1218_v11 = vld [vmem:[%s1510_s23 + $0x48] sm:$0xff]   ;;  %v1220_v13 = vld [vmem:[%s1510_s23 + $0x50] sm:$0xff]   ;;  %s1359_s9 = smov [#allocation7]  }
  0x4d   : > { %v1221_v14 = vld [vmem:[%s1510_s23 + $0x18] sm:$0xff]   ;;  %v1223_v16 = vld [vmem:[%s1510_s23 + $0x20] sm:$0xff]   ;;  %v1225_v18 = vld [vmem:[%s1510_s23 + $0x28] sm:$0xff]   ;;  %p1287_p7 = pnand %p1286_p3, %p1662_p11  ;;  %s1289_s7 = sshll.u32 %s1359_s9, 4  ;;  %s1290_s7 = int_to_ptr.vmem [resolvable:$false] %s1289_s7 }
  0x4e   : > { %1085 = vmatpush3.bf16.msra.mxu0 %v1208_v1  ;;  %1139 = vmatpush3.bf16.msra.mxu1 %v1208_v1  ;;  %v1222_v15 = vld [vmem:[%s1510_s23 + $0x58] sm:$0xff]   ;;  %v1224_v17 = vld [vmem:[%s1510_s23 + $0x60] sm:$0xff]   ;;  %v1226_v19 = vld [vmem:[%s1510_s23 + $0x68] sm:$0xff]   ;;  %s1291_s10 = scalar_lea.vmem %s1290_s7, 4096  ;;  %p1292_p10 = scmp.lt.s32.totalorder %s1596_s17, %s1290_s7 }
  0x4f   : > { %1086 = vmatprep.subr.bf16.mxu0 %v1209_v2  ;;  %1132 = vmatprep.subr.bf16.mxu1 %v1209_v2  ;;  %v1227_v20 = vld [vmem:[%s1510_s23 + $0x30] sm:$0xff]   ;;  %v1229_v22 = vld [vmem:[%s1510_s23 + $0x38] sm:$0xff]   ;;  %v1539_v24 = vld [vmem:[%s1645_s2] ss:$0 sm:$0xff]  ;;  %p1288_p9 = pneg %p1287_p7  ;;  %p1293_p12 = scmp.lt.s32.totalorder %s1291_s10, %s1285_s8 }
  0x50   : > { %v1228_v21 = vld [vmem:[%s1510_s23 + $0x70] sm:$0xff]   ;;  %v1230_v23 = vld [vmem:[%s1510_s23 + $0x78] sm:$0xff]  }
  0x51   : > { %p1294_p13 = por %p1293_p12, %p1292_p10 }
  0x52   : > { %1087 = vmatpush3.bf16.msra.mxu0 %v1209_v2  ;;  %1140 = vmatpush3.bf16.msra.mxu1 %v1209_v2 }
  0x53   : > { %1088 = vmatprep.subr.bf16.mxu0 %v1210_v3  ;;  %1133 = vmatprep.subr.bf16.mxu1 %v1210_v3  ;;  %p1295_p0 = pnand %p1294_p13, %p1288_p9 }
  0x56   : > { %1089 = vmatpush3.bf16.msra.mxu0 %v1210_v3  ;;  %1141 = vmatpush3.bf16.msra.mxu1 %v1210_v3 }
  0x57   : > { %1090 = vmatprep.subr.bf16.mxu0 %v1211_v6  ;;  %1134 = vmatprep.subr.bf16.mxu1 %v1211_v6 }
  0x5a   : > { %1091 = vmatpush3.bf16.msra.mxu0 %v1211_v6  ;;  %1142 = vmatpush3.bf16.msra.mxu1 %v1211_v6 }
  0x5b   : > { %1092 = vmatprep.subr.bf16.mxu0 %v1212_v7  ;;  %1135 = vmatprep.subr.bf16.mxu1 %v1212_v7 }
  0x5e   : > { %1093 = vmatpush3.bf16.msra.mxu0 %v1212_v7  ;;  %1143 = vmatpush3.bf16.msra.mxu1 %v1212_v7 }
  0x5f   : > { %1094 = vmatprep.subr.bf16.mxu0 %v1213_v8  ;;  %1136 = vmatprep.subr.bf16.mxu1 %v1213_v8 }
  0x62   : > { %1095 = vmatpush3.bf16.msra.mxu0 %v1213_v8  ;;  %1144 = vmatpush3.bf16.msra.mxu1 %v1213_v8 }
  0x63   : > { %1096 = vmatprep.subr.bf16.mxu0 %v1214_v9  ;;  %1137 = vmatprep.subr.bf16.mxu1 %v1214_v9 }
  0x66   : > { %1097 = vmatpush3.bf16.msra.mxu0 %v1214_v9  ;;  %1145 = vmatpush3.bf16.msra.mxu1 %v1214_v9 }
  0x69   : > { %1099 = vmatmul.mubr.bf16.vlgmr.msra.gmra.mxu0 %v1217_v10  ;;  %1115 = vmatmul.mubr.bf16.vlgmr.msra.gmra.mxu1 %v1218_v11 }
  0x6a   : > { %1102 = vmatprep.mubr.bf16.mxu0 %v1219_v12  ;;  %1118 = vmatprep.mubr.bf16.mxu1 %v1220_v13 }
  0x71   : > { %1103 = vmatmul.mubr.bf16.gmra.mxu0 %v1221_v14  ;;  %1119 = vmatmul.mubr.bf16.gmra.mxu1 %v1222_v15 }
  0x72   : > { %1106 = vmatprep.mubr.bf16.mxu0 %v1223_v16  ;;  %1122 = vmatprep.mubr.bf16.mxu1 %v1224_v17 }
  0x79   : > { %1107 = vmatmul.mubr.bf16.gmra.mxu0 %v1225_v18  ;;  %1123 = vmatmul.mubr.bf16.gmra.mxu1 %v1226_v19 }
  0x7a   : > { %1110 = vmatprep.mubr.bf16.mxu0 %v1227_v20  ;;  %1126 = vmatprep.mubr.bf16.mxu1 %v1228_v21 }
  0x81   : > { %1111 = vmatmul.mubr.bf16.gmra.mxu0 %v1229_v22  ;;  %1127 = vmatmul.mubr.bf16.gmra.mxu1 %v1230_v23 }
 0x129   : > { %v1100_v25 = vpop.f32.mrf.mxu0  ;;  %v1116_v26 = vpop.f32.mrf.mxu1 }
 0x12a   : > { %v449_v27 = vadd.f32 %v1100_v25, %v1539_v24  ;;  %v513_v28 = vadd.f32 %v1116_v26, %v1539_v24 }
 0x12b   : > { %v440_v29 = vpop.f32.mrf.mxu0  ;;  %v504_v30 = vpop.f32.mrf.mxu1 }
 0x12c   : > { %v441_v31 = vadd.f32 %v1539_v24, %v440_v29  ;;  %v505_v32 = vadd.f32 %v1539_v24, %v504_v30  ;;  %v569_v37 = vmax.f32 %v449_v27, 0.0  ;;  %v585_v38 = vmax.f32 %v513_v28, 0.0 }
 0x12d   : > { %v1101_v33 = vpop.f32.mrf.mxu0  ;;  %v1117_v34 = vpop.f32.mrf.mxu1 }
 0x12e   : > { %v452_v35 = vadd.f32 %v1101_v33, %v1539_v24  ;;  %v516_v36 = vadd.f32 %v1117_v34, %v1539_v24  ;;  %v567_v45 = vmax.f32 %v441_v31, 0.0  ;;  %v583_v46 = vmax.f32 %v505_v32, 0.0 }
 0x12f   : > { %v443_v39 = vpop.f32.mrf.mxu0  ;;  %v507_v40 = vpop.f32.mrf.mxu1 }
 0x130   : > { %v570_v41 = vmax.f32 %v452_v35, 0.0  ;;  %v586_v42 = vmax.f32 %v516_v36, 0.0  ;;  %v444_v43 = vadd.f32 %v1539_v24, %v443_v39  ;;  %v508_v44 = vadd.f32 %v1539_v24, %v507_v40 }
 0x131   : > { %v1104_v47 = vpop.f32.mrf.mxu0  ;;  %v1120_v48 = vpop.f32.mrf.mxu1 }
 0x132   : > { %v971_v49 = vpack.c.bf16 %v570_v41, %v569_v37  ;;  %v1011_v50 = vpack.c.bf16 %v586_v42, %v585_v38  ;;  %v568_v51 = vmax.f32 %v444_v43, 0.0  ;;  %v584_v52 = vmax.f32 %v508_v44, 0.0 }
 0x133   : > { %v465_v53 = vadd.f32 %v1104_v47, %v1539_v24  ;;  %v529_v54 = vadd.f32 %v1120_v48, %v1539_v24  ;;  %v456_v55 = vpop.f32.mrf.mxu0  ;;  %v520_v56 = vpop.f32.mrf.mxu1 }
 0x134   : > { %1043 = vst [vmem:[%s1553_s28 + $0x8] sm:$0xff] %v971_v49   ;;  %1051 = vst [vmem:[%s1553_s28 + $0x48] sm:$0xff] %v1011_v50   ;;  %v966_v57 = vpack.c.bf16 %v568_v51, %v567_v45  ;;  %v1006_v58 = vpack.c.bf16 %v584_v52, %v583_v46  ;;  %v457_v59 = vadd.f32 %v1539_v24, %v456_v55 }
 0x135   : > { %v521_v60 = vadd.f32 %v1539_v24, %v520_v56  ;;  %v1105_v61 = vpop.f32.mrf.mxu0  ;;  %v1121_v62 = vpop.f32.mrf.mxu1  ;;  %v573_v1 = vmax.f32 %v465_v53, 0.0  ;;  %v589_v2 = vmax.f32 %v529_v54, 0.0 }
 0x136   : > { %967 = vst [vmem:[%s1553_s28] sm:$0xff] %v966_v57   ;;  %1050 = vst [vmem:[%s1553_s28 + $0x40] sm:$0xff] %v1006_v58   ;;  %v468_v63 = vadd.f32 %v1105_v61, %v1539_v24  ;;  %v532_v0 = vadd.f32 %v1121_v62, %v1539_v24  ;;  %v571_v9 = vmax.f32 %v457_v59, 0.0 }
 0x137   : > { %v459_v3 = vpop.f32.mrf.mxu0  ;;  %v523_v4 = vpop.f32.mrf.mxu1  ;;  %v587_v10 = vmax.f32 %v521_v60, 0.0 }
 0x138   : > { %v574_v5 = vmax.f32 %v468_v63, 0.0  ;;  %v590_v6 = vmax.f32 %v532_v0, 0.0  ;;  %v460_v7 = vadd.f32 %v1539_v24, %v459_v3  ;;  %v524_v8 = vadd.f32 %v1539_v24, %v523_v4 }
 0x139   : > { %v1108_v11 = vpop.f32.mrf.mxu0  ;;  %v1124_v12 = vpop.f32.mrf.mxu1 }
 0x13a   : > { %v981_v13 = vpack.c.bf16 %v574_v5, %v573_v1  ;;  %v1021_v14 = vpack.c.bf16 %v590_v6, %v589_v2  ;;  %v572_v15 = vmax.f32 %v460_v7, 0.0  ;;  %v588_v16 = vmax.f32 %v524_v8, 0.0 }
 0x13b   : > { %v481_v17 = vadd.f32 %v1108_v11, %v1539_v24  ;;  %v545_v18 = vadd.f32 %v1124_v12, %v1539_v24  ;;  %v472_v19 = vpop.f32.mrf.mxu0  ;;  %v536_v20 = vpop.f32.mrf.mxu1 }
 0x13c   : > { %1045 = vst [vmem:[%s1553_s28 + $0x18] sm:$0xff] %v981_v13   ;;  %1053 = vst [vmem:[%s1553_s28 + $0x58] sm:$0xff] %v1021_v14   ;;  %v976_v21 = vpack.c.bf16 %v572_v15, %v571_v9  ;;  %v1016_v22 = vpack.c.bf16 %v588_v16, %v587_v10  ;;  %v473_v23 = vadd.f32 %v1539_v24, %v472_v19 }
 0x13d   : > { %v537_v25 = vadd.f32 %v1539_v24, %v536_v20  ;;  %v1109_v26 = vpop.f32.mrf.mxu0  ;;  %v1125_v27 = vpop.f32.mrf.mxu1  ;;  %v577_v30 = vmax.f32 %v481_v17, 0.0  ;;  %v593_v31 = vmax.f32 %v545_v18, 0.0 }
 0x13e   : > { %1044 = vst [vmem:[%s1553_s28 + $0x10] sm:$0xff] %v976_v21   ;;  %1052 = vst [vmem:[%s1553_s28 + $0x50] sm:$0xff] %v1016_v22   ;;  %v484_v28 = vadd.f32 %v1109_v26, %v1539_v24  ;;  %v548_v29 = vadd.f32 %v1125_v27, %v1539_v24  ;;  %v575_v38 = vmax.f32 %v473_v23, 0.0 }
 0x13f   : > { %v475_v32 = vpop.f32.mrf.mxu0  ;;  %v539_v33 = vpop.f32.mrf.mxu1  ;;  %v591_v39 = vmax.f32 %v537_v25, 0.0 }
 0x140   : > { %v578_v34 = vmax.f32 %v484_v28, 0.0  ;;  %v594_v35 = vmax.f32 %v548_v29, 0.0  ;;  %v476_v36 = vadd.f32 %v1539_v24, %v475_v32  ;;  %v540_v37 = vadd.f32 %v1539_v24, %v539_v33 }
 0x141   : > { %v1112_v40 = vpop.f32.mrf.mxu0  ;;  %v1128_v41 = vpop.f32.mrf.mxu1 }
 0x142   : > { %v991_v42 = vpack.c.bf16 %v578_v34, %v577_v30  ;;  %v1031_v43 = vpack.c.bf16 %v594_v35, %v593_v31  ;;  %v576_v44 = vmax.f32 %v476_v36, 0.0  ;;  %v592_v45 = vmax.f32 %v540_v37, 0.0 }
 0x143   : > { %v497_v46 = vadd.f32 %v1112_v40, %v1539_v24  ;;  %v561_v47 = vadd.f32 %v1128_v41, %v1539_v24  ;;  %v488_v48 = vpop.f32.mrf.mxu0  ;;  %v552_v49 = vpop.f32.mrf.mxu1 }
 0x144   : > { %1047 = vst [vmem:[%s1553_s28 + $0x28] sm:$0xff] %v991_v42   ;;  %1055 = vst [vmem:[%s1553_s28 + $0x68] sm:$0xff] %v1031_v43   ;;  %v986_v50 = vpack.c.bf16 %v576_v44, %v575_v38  ;;  %v1026_v51 = vpack.c.bf16 %v592_v45, %v591_v39  ;;  %v489_v52 = vadd.f32 %v1539_v24, %v488_v48 }
 0x145   : > { %v553_v53 = vadd.f32 %v1539_v24, %v552_v49  ;;  %v1113_v54 = vpop.f32.mrf.mxu0  ;;  %v1129_v55 = vpop.f32.mrf.mxu1  ;;  %v581_v58 = vmax.f32 %v497_v46, 0.0  ;;  %v597_v59 = vmax.f32 %v561_v47, 0.0 }
 0x146   : > { %1046 = vst [vmem:[%s1553_s28 + $0x20] sm:$0xff] %v986_v50   ;;  %1054 = vst [vmem:[%s1553_s28 + $0x60] sm:$0xff] %v1026_v51   ;;  %v500_v56 = vadd.f32 %v1113_v54, %v1539_v24  ;;  %v564_v57 = vadd.f32 %v1129_v55, %v1539_v24  ;;  %v579_v2 = vmax.f32 %v489_v52, 0.0 }
 0x147   : > { %v491_v60 = vpop.f32.mrf.mxu0  ;;  %v555_v61 = vpop.f32.mrf.mxu1  ;;  %v595_v3 = vmax.f32 %v553_v53, 0.0 }
 0x148   : > { %v582_v62 = vmax.f32 %v500_v56, 0.0  ;;  %v598_v63 = vmax.f32 %v564_v57, 0.0  ;;  %v492_v0 = vadd.f32 %v1539_v24, %v491_v60  ;;  %v556_v1 = vadd.f32 %v1539_v24, %v555_v61 }
 0x14a   : > { %v1001_v4 = vpack.c.bf16 %v582_v62, %v581_v58  ;;  %v1041_v5 = vpack.c.bf16 %v598_v63, %v597_v59  ;;  %v580_v6 = vmax.f32 %v492_v0, 0.0  ;;  %v596_v7 = vmax.f32 %v556_v1, 0.0 }
 0x14c   : > { %1049 = vst [vmem:[%s1553_s28 + $0x38] sm:$0xff] %v1001_v4   ;;  %1057 = vst [vmem:[%s1553_s28 + $0x78] sm:$0xff] %v1041_v5   ;;  %v996_v24 = vpack.c.bf16 %v580_v6, %v579_v2  ;;  %v1036_v8 = vpack.c.bf16 %v596_v7, %v595_v3 }
 0x14e   : > { %1048 = vst [vmem:[%s1553_s28 + $0x30] sm:$0xff] %v996_v24   ;;  %1056 = vst [vmem:[%s1553_s28 + $0x70] sm:$0xff] %v1036_v8  }
 0x14f   : > { %1298 = shalt.err (!%p1295_p0)
}
 0x150   : > { %s1299_s11 = scalar_lea.hbm %s1594_s4, 2048  ;;  %s1303_s30 = scalar_lea.hbm %s1646_s3, 4096 }
 0x151   : > { %p1300_p5 = scmp.ne.s32.totalorder %s1594_s4, %s1299_s11  ;;  %p1304_p4 = scmp.lt.s32.totalorder %s1594_s4, %s1646_s3 }
 0x152   : > { %p1305_p6 = scmp.lt.s32.totalorder %s1303_s30, %s1299_s11 }
 0x153   : > { %p1301_p2 = pnand %p1300_p5, %p1662_p11 }
 0x154   : > { %p1306_p8 = por %p1305_p6, %p1304_p4 }
 0x155   : > { %p1302_p1 = pneg %p1301_p2 }
 0x157   : > { %p1307_p3 = pnand %p1306_p8, %p1302_p1 }
 0x159   : > { %1310 = shalt.err (!%p1307_p3)
}
 0x15a   : > { %s1360_s20 = smov 64   ;;  %s1361_s28 = smov 4  }
 0x15b   : > { %1152 = dma.vmem_to_hbm [thread:$0]  (%p1662_p11), %s1596_s17, 2048, %s1594_s4, %s760_s16, %s1360_s20, %s1360_s20, %s1361_s28  }
 0x15c PF: > { %s788_s29 = sand.u32 1, %s1341_s12   ;;  %p1663_p7 = scmp.ne.s32.totalorder %s1652_s19, 0 }
 0x15d   : > { %p1664_p9 = scmp.ge.s32.totalorder %s1353_s15, 2  ;;  %s789_s22 = scalar_lea.sflag [#allocation4], %s788_s29 }
 0x15f   : > { %p1163_p10 = pnand %p1664_p9, %p1663_p7 }
 0x161   : > { %p1164_p12 = pneg %p1163_p10 }
 0x163   : > { %1336 = dma.done.wait (%p1164_p12), %s789_s22, 2048  }
 0x164   : > { %1338 = vsyncadd (%p1164_p12), %s789_s22, 4294965248  ;;  %p17_p13 = scmp.ge.s32.totalorder %s1436_s24, 4   ;;  %s1665_s12 = smov %s1345_s13 }
 0x165   : > { %s1666_s13 = smov %s1349_s14  ;;  %s1667_s14 = smov %s1456_s5 }
 0x166   : > { %s1668_s15 = smov %s1436_s24  ;;  %19 = sbr.rel (!%p17_p13) target bundleno = 6 (0x6), region = 81 }
 0x16b   :  { %794 = vsyncpa [#allocation3], 1 }
 0x16c   :  { %796 = vsyncpa [#allocation3 + $0x1], 1 }
 0x16d   :  { %797 = vsyncpa [#allocation6], 1 }
 0x16e   :  { %798 = vsyncpa [#allocation4], 1 }
 0x16f   :  { %800 = vsyncpa [#allocation4 + $0x1], 1 }

</bundles_post_ra>
